<compile_context>
chip_gen: v7x
topology: tpu7x:2x2x1
jax: 0.10.0
libtpu: 0.0.40
codegen_flags: <defaults>
</compile_context>

<pallas_src>
import jax
import jax.numpy as jnp
from jax.experimental import pallas as pl
from jax.experimental.pallas import tpu as pltpu

_LANE_CHOICES = (512, 256, 128)      # lane-dense column widths (multiples of 128)
_TARGET_TILE_BYTES = 2 * 1024 * 1024  # ~2 MiB per buffer (x2 buffers x in/out = 8 MiB)
_PALLAS_MIN_ELEMS = 1024              # below this, plain XLA sigmoid is strictly faster


def _sigmoid_kernel(x_ref, o_ref):
    # Exact sigmoid, computed in f32.  exp(-x) -> inf for very negative x still
    # gives the correct limit 0 under exact division (1 / (1 + inf) == 0).
    x = x_ref[...].astype(jnp.float32)
    y = 1.0 / (1.0 + jnp.exp(-x))          # EUP exp + exact VPU divide
    o_ref[...] = y.astype(o_ref.dtype)


def _sigmoid_pallas_2d(x2d):
    """Tiled, double-buffered elementwise sigmoid over a (rows, cols) slab.

    cols must be a multiple of 128 (lane-dense, unmasked vector stores).
    """
    rows, cols = x2d.shape
    assert cols % 128 == 0

    itemsize = jnp.dtype(x2d.dtype).itemsize
    # ~2 MiB of bytes per buffer regardless of dtype; multiple of 8 sublanes.
    target_rows = max(8, ((_TARGET_TILE_BYTES // (cols * itemsize)) // 8) * 8)

    if rows <= target_rows:
        # Single block covering the whole array (block dim == full dim, so the
        # sublane divisibility constraint does not apply).
        tile_rows = rows
        grid = (1,)
    else:
        tile_rows = target_rows
        grid = (pl.cdiv(rows, tile_rows),)  # ragged last block handled by Pallas

    return pl.pallas_call(
        _sigmoid_kernel,
        out_shape=jax.ShapeDtypeStruct(x2d.shape, x2d.dtype),
        grid=grid,
        in_specs=[pl.BlockSpec((tile_rows, cols), lambda i: (i, 0))],
        out_specs=pl.BlockSpec((tile_rows, cols), lambda i: (i, 0)),
        compiler_params=pltpu.CompilerParams(
            dimension_semantics=("parallel",),   # lets v7x's 2 TCs split the grid
        ),
    )(x2d)


def ack_forward(x):
    """Forward pass of `Ack`: sigmoid over the (reshaped) NCHW input."""
    # Mirror the reference script's reshape: input -> (-1, 1, 2, 2)
    x = jnp.reshape(x, (-1, 1, 2, 2))
    orig_shape = x.shape
    n = x.size

    # Tiny inputs: pallas_call dispatch dwarfs the compute; use XLA directly.
    if n < _PALLAS_MIN_ELEMS:
        return jax.nn.sigmoid(x)

    # Pick a lane-dense column width that exactly divides numel, so no padding
    # copy / trailing slice (each would be a full extra HBM pass) is needed.
    cols = next((c for c in _LANE_CHOICES if n % c == 0), None)
    if cols is None:
        # No pad-free lane-dense factorization; fused XLA sigmoid is already
        # at the HBM roofline for this elementwise op.
        return jax.nn.sigmoid(x)

    x2d = jnp.reshape(x, (-1, cols))
    y2d = _sigmoid_pallas_2d(x2d)
    return jnp.reshape(y2d, orig_shape)


if __name__ == "__main__":
    key = jax.random.PRNGKey(0)
    k1, k2 = jax.random.split(key)

    # 1) Input large enough to exercise the Pallas path
    #    (2*4*16*16 = 2048 elements, consistent with the module's reshape).
    x_big = jax.random.normal(k1, (2, 4, 16, 16), dtype=jnp.float32)
    out_big = ack_forward(x_big)
    jax.block_until_ready(out_big)
    ref_big = jax.nn.sigmoid(jnp.reshape(x_big, (-1, 1, 2, 2)))
    assert out_big.shape == ref_big.shape
    assert jnp.allclose(out_big, ref_big, atol=1e-5, rtol=1e-5), \
        "mismatch vs reference sigmoid (pallas path)"

    # 2) Tiny input (8 elements) takes the XLA fast path.
    x_small = jax.random.normal(k2, (2, 1, 2, 2), dtype=jnp.float32)
    out_small = ack_forward(x_small)
    jax.block_until_ready(out_small)
    ref_small = jax.nn.sigmoid(jnp.reshape(x_small, (-1, 1, 2, 2)))
    assert out_small.shape == ref_small.shape
    assert jnp.allclose(out_small, ref_small, atol=1e-6), \
        "mismatch vs reference sigmoid (small path)"

    print("KERNEL_OK")
</pallas_src>

<mosaic_0001>
module attributes {stable_mosaic.version = 11 : i64} {
  func.func @_sigmoid_kernel(%arg0: i32, %arg1: memref<4x512xf32, #tpu.memory_space<vmem>>, %arg2: memref<4x512xf32, #tpu.memory_space<vmem>>) attributes {dimension_semantics = [#tpu.dimension_semantics<parallel>], iteration_bounds = array<i64: 1>, scalar_prefetch = 0 : i64, scratch_operands = 0 : i64, tpu.core_type = #tpu.core_type<tc>, window_params = [{transform_indices = @transform_0, window_bounds = array<i64: 4, 512>}, {transform_indices = @transform_1, window_bounds = array<i64: 4, 512>}]} {
    %c0 = arith.constant 0 : index
    %c0_0 = arith.constant 0 : index
    %0 = vector.load %arg1[%c0, %c0_0] : memref<4x512xf32, #tpu.memory_space<vmem>>, vector<4x512xf32>
    %cst = arith.constant 0.000000e+00 : f32
    %1 = vector.broadcast %cst : f32 to vector<4x512xf32>
    %2 = arith.subf %1, %0 : vector<4x512xf32>
    %3 = math.exp %2 : vector<4x512xf32>
    %cst_1 = arith.constant 1.000000e+00 : f32
    %4 = vector.broadcast %cst_1 : f32 to vector<4x512xf32>
    %5 = arith.addf %4, %3 : vector<4x512xf32>
    %cst_2 = arith.constant 1.000000e+00 : f32
    %6 = vector.broadcast %cst_2 : f32 to vector<4x512xf32>
    %7 = arith.divf %6, %5 : vector<4x512xf32>
    %c0_3 = arith.constant 0 : index
    %c0_4 = arith.constant 0 : index
    %8 = vector.load %arg2[%c0_3, %c0_4] : memref<4x512xf32, #tpu.memory_space<vmem>>, vector<4x512xf32>
    tpu.vector_store %arg2[%c0_3, %c0_4], %7 {strides = array<i32>} : memref<4x512xf32, #tpu.memory_space<vmem>>, vector<4x512xf32>,
    return
  }
  func.func @transform_0(%arg0: i32) -> (i32, i32) {
    %c0_i32 = arith.constant 0 : i32
    %c0_i32_0 = arith.constant 0 : i32
    return %arg0, %c0_i32 : i32, i32
  }
  func.func @transform_1(%arg0: i32) -> (i32, i32) {
    %c0_i32 = arith.constant 0 : i32
    %c0_i32_0 = arith.constant 0 : i32
    return %arg0, %c0_i32 : i32, i32
  }
}

</mosaic_0001>

<bundles_post_ra>
// kernel: tpu_custom_call.1
= control target key start
LH: loop header
LB: loop body
LE: loop exit
PB: predicated region body
PF: predicated region fallthrough
CT: control target
= control target key end

     0   :  { %6 = vsyncpa [#allocation3], 0  ;;  %s146_s0 = inlined_call_operand.hbm [shape: f32[4,512], index: 0, kind: input, shape index: {}]   ;;  %s147_s1 = inlined_call_operand.hbm [shape: f32[4,512], index: 1, kind: output, shape index: {}]  }
   0x1   :  { %7 = vsyncpa [#allocation4], 0  ;;  %s110_s6 = smov [#allocation2]   ;;  %s62_s10 = scalar_lea.hbm %s146_s0, 256 }
   0x2   :  { %s14_s7 = sshll.u32 %s110_s6, 4  ;;  %p63_p0 = scmp.ne.s32.totalorder %s146_s0, %s62_s10  ;;  %s15_s7 = int_to_ptr.vmem [resolvable:$true] %s14_s7 }
   0x3   :  { %p66_p1 = scmp.lt.u32.totalorder %s62_s10, %s146_s0 }
   0x5   :  { %p68_p2 = pnand %p66_p1, %p63_p0 }
   0x7   :  { %71 = shalt.err (!%p68_p2)
}
   0x8   :  { %s72_s15 = scalar_lea.vmem %s15_s7, 256  ;;  %p77_p4 = scmp.lt.s32.totalorder %s15_s7, %s15_s7 }
   0x9   :  { %p73_p3 = scmp.ne.s32.totalorder %s15_s7, %s72_s15  ;;  %p78_p5 = scmp.lt.s32.totalorder %s72_s15, %s72_s15 }
   0xb   :  { %p79_p6 = por %p78_p5, %p77_p4 }
   0xd   :  { %p80_p7 = pnand %p79_p6, %p73_p3 }
   0xf   :  { %83 = shalt.err (!%p80_p7)
}
  0x10   :  { %17 = dma.hbm_to_vmem [thread:$0]  %s146_s0, 256, %s15_s7, [#allocation3]  }
  0x11   :  { %106 = dma.done.wait [#allocation3], 256  }
  0x12   :  { %107 = vsyncadd [#allocation3], 4294967040  ;;  %v21_v0 = vld [vmem:[#allocation2] sm:$0xff]  ;;  %v22_v1 = vld [vmem:[#allocation2 + $0x8] sm:$0xff]  ;;  %s111_s18 = smov [#allocation5]  }
  0x13   :  { %v23_v2 = vsub.f32 0.0, %v21_v0  ;;  %v24_v3 = vsub.f32 0.0, %v22_v1  ;;  %s43_s19 = sshll.u32 %s111_s18, 4  ;;  %s44_s19 = int_to_ptr.vmem [resolvable:$true] %s43_s19 }
  0x14   :  { %s84_s0 = scalar_lea.vmem %s44_s19, 256  ;;  %p89_p9 = scmp.lt.s32.totalorder %s44_s19, %s44_s19 }
  0x15   :  { %v25_v4 = vmul.f32 1.442695, %v23_v2  ;;  %v27_v5 = vmul.f32 1.442695, %v24_v3  ;;  %p85_p8 = scmp.ne.s32.totalorder %s44_s19, %s84_s0  ;;  %p90_p10 = scmp.lt.s32.totalorder %s84_s0, %s84_s0 }
  0x17   :  { %54 = vpow2.f32 %v25_v4  ;;  %p91_p11 = por %p90_p10, %p89_p9 }
  0x18   :  { %56 = vpow2.f32 %v27_v5 }
  0x19   :  { %p92_p12 = pnand %p91_p11, %p85_p8 }
  0x21   :  { %v55_v6 = vpop.eup %54 }
  0x22   :  { %v57_v7 = vpop.eup %56  ;;  %v29_v8 = vadd.f32 1.0, %v55_v6 }
  0x23   :  { %v30_v9 = vadd.f32 1.0, %v57_v7 }
  0x24   :  { %58 = vrcp.f32 %v29_v8 }
  0x25   :  { %60 = vrcp.f32 %v30_v9 }
  0x2e   :  { %v59_v10 = vpop.eup %58 }
  0x2f   :  { %v61_v11 = vpop.eup %60  ;;  %35 = vst [vmem:[#allocation5] sm:$0xff] %v59_v10 }
  0x30   :  { %36 = vst [vmem:[#allocation5 + $0x8] sm:$0xff] %v61_v11 }
  0x31   :  { %95 = shalt.err (!%p92_p12)
}
  0x32   :  { %s96_s22 = scalar_lea.hbm %s147_s1, 256 }
  0x33   :  { %p97_p13 = scmp.ne.s32.totalorder %s147_s1, %s96_s22  ;;  %p100_p0 = scmp.lt.u32.totalorder %s96_s22, %s147_s1 }
  0x35   :  { %p102_p1 = pnand %p100_p0, %p97_p13 }
  0x37   :  { %105 = shalt.err (!%p102_p1)
}
  0x38   :  { %46 = dma.vmem_to_hbm [thread:$0]  %s44_s19, 256, %s147_s1, [#allocation4]  }
  0x39   :  { %108 = dma.done.wait [#allocation4], 256  }
  0x3a   :  { %109 = vsyncadd [#allocation4], 4294967040 }
  0x3b   :  { %50 = vsyncpa [#allocation3], 1 }
  0x3c   :  { %51 = vsyncpa [#allocation4], 1 }

</bundles_post_ra>
